<compile_context>
chip_gen: v6e
topology: v6e:2x2x1
jax: 0.10.0
libtpu: 0.0.40
codegen_flags: <defaults>
</compile_context>

<pallas_src>
import math

import jax
import jax.numpy as jnp
from jax.experimental import pallas as pl
from jax.experimental.pallas import tpu as pltpu


def _round_up(a, b):
    return ((a + b - 1) // b) * b


def _linear_kernel(x_ref, w_ref, b_ref, o_ref):
    # (TM, K) @ (K, TN) on the MXU with f32 accumulation; bias add on the VPU;
    # cast on store to the output dtype.
    acc = jnp.dot(x_ref[...], w_ref[...], preferred_element_type=jnp.float32)
    o_ref[...] = (acc + b_ref[...]).astype(o_ref.dtype)


def _vmem_capacity_bytes():
    """Physical VMEM of the current chip; conservative (v7x) fallback."""
    try:
        return int(pltpu.get_tpu_info().vmem_capacity_bytes)
    except Exception:
        return 64 * 2**20


def _tile_plan(M, K, N, x_isz, w_isz, out_isz, b_isz, block_m, block_n):
    """Pick (TM, TN, vmem_limit) from the chip's VMEM capacity and real itemsizes."""
    vmem_cap = _vmem_capacity_bytes()
    # Tile-sizing budget: ~28 MiB on v7x (64 MiB VMEM), ~56 MiB on v5e/v6e (128 MiB).
    budget = int(0.45 * vmem_cap)
    # Scoped limit: leave headroom for Mosaic internal scratch; always set it
    # (v5e's default scoped limit is only 16 MiB).
    vmem_limit = int(max(32 * 2**20, min(vmem_cap - 12 * 2**20, 100 * 2**20)))

    k_lanes = _round_up(K, 128)  # x minor dim pads to >=128 lanes in VMEM

    def tm_for(tn):
        tn_lanes = _round_up(tn, 128)
        # Resident (double-buffered) weight + bias footprint, subtracted from budget.
        resident = (2 * _round_up(K, 8) * tn_lanes * w_isz
                    + 2 * 8 * tn_lanes * b_isz)
        # Double-buffered x row + out row.
        per_row = 2 * (k_lanes * x_isz + tn_lanes * out_isz)
        avail = budget - resident
        if avail < 8 * per_row:
            return 8
        return int(min(4096, (avail // per_row) // 8 * 8))

    # ---- N tile ----------------------------------------------------------
    if block_n is not None:
        tn = min(int(block_n), N)
        if tn != N and tn % 128 != 0:
            raise ValueError("block_n must be a multiple of 128 (or >= d_model)")
    else:
        tn = N
        # Enable lane-dense N tiling only when a single N tile would starve TM.
        if N > 512 and tm_for(tn) < 256:
            tn = 512

    # ---- M tile ----------------------------------------------------------
    if block_m is not None:
        tm = int(block_m)
        if tm % 8 != 0:
            raise ValueError("block_m must be a multiple of 8")
    else:
        tm = tm_for(tn)
        # Keep >= ~8 row tiles for large M (v7x: two TensorCores + deep writeback
        # pipeline), but never shrink TM below 256 just to get more steps.
        tm = min(tm, max(256, _round_up(pl.cdiv(M, 8), 8)))
    tm = max(8, min(tm, _round_up(M, 8)))

    return tm, tn, vmem_limit


def prepare_linear_params(weight, bias):
    """One-time parameter prep (call at init, NOT per forward).

    weight: (d_model, c_in) PyTorch layout -> (c_in, d_model)
    bias:   (d_model,)                     -> (1, d_model)
    """
    w_t = jnp.asarray(weight).T
    b2d = jnp.asarray(bias).reshape(1, -1)
    return w_t, b2d


def token_embedding_fwd(x, w_t, b2d, *, out_dtype=None, block_m=None, block_n=None):
    """y = x @ w_t + b2d with pre-prepared params (steady-state path).

    x:   (B, S, c_in)
    w_t: (c_in, d_model)   -- already transposed (prepare_linear_params)
    b2d: (1, d_model)
    returns (B, S, d_model) in `out_dtype` (defaults to x.dtype; bf16 halves
    output HBM writeback and is strongly encouraged for large d_model).
    """
    B, S, K = x.shape
    Kw, N = w_t.shape
    assert Kw == K, "weight/input feature-dim mismatch"
    out_dtype = jnp.dtype(x.dtype if out_dtype is None else out_dtype)

    M = B * S
    x2d = x.reshape(M, K)
    # Pad M only to a multiple of 8 (usually a no-op since B*S is 8-aligned).
    M_pad = _round_up(M, 8)
    if M_pad != M:
        x2d = jnp.pad(x2d, ((0, M_pad - M), (0, 0)))

    tm, tn, vmem_limit = _tile_plan(
        M_pad, K, N,
        jnp.dtype(x.dtype).itemsize, jnp.dtype(w_t.dtype).itemsize,
        out_dtype.itemsize, jnp.dtype(b2d.dtype).itemsize,
        block_m, block_n)

    grid = (pl.cdiv(M_pad, tm), pl.cdiv(N, tn))

    cost = pl.CostEstimate(
        flops=2 * M * K * N,
        transcendentals=0,
        bytes_accessed=(x.size * jnp.dtype(x.dtype).itemsize
                        + w_t.size * jnp.dtype(w_t.dtype).itemsize
                        + b2d.size * jnp.dtype(b2d.dtype).itemsize
                        + M * N * out_dtype.itemsize),
    )

    out2d = pl.pallas_call(
        _linear_kernel,
        out_shape=jax.ShapeDtypeStruct((M_pad, N), out_dtype),
        grid=grid,
        in_specs=[
            pl.BlockSpec((tm, K), lambda i, j: (i, 0)),   # streamed row tiles (resident across N sweep)
            pl.BlockSpec((K, tn), lambda i, j: (0, j)),   # weight tile: resident across row sweep
            pl.BlockSpec((1, tn), lambda i, j: (0, j)),   # bias tile:   resident across row sweep
        ],
        out_specs=pl.BlockSpec((tm, tn), lambda i, j: (i, j)),
        compiler_params=pltpu.CompilerParams(
            dimension_semantics=("parallel", "parallel"),  # row tiles split across TCs on v7x
            vmem_limit_bytes=vmem_limit,
        ),
        cost_estimate=cost,
    )(x2d, w_t, b2d)

    if M_pad != M:
        out2d = out2d[:M]
    return out2d.reshape(B, S, N)


def token_embedding_basic(x, weight, bias, **kwargs):
    """Convenience path with PyTorch-layout params (weight (d_model, c_in)).

    For repeated forwards, hoist prepare_linear_params() to init and call
    token_embedding_fwd() directly to avoid the per-call transpose copy.
    """
    w_t, b2d = prepare_linear_params(weight, bias)
    return token_embedding_fwd(x, w_t, b2d, **kwargs)


if __name__ == "__main__":
    key = jax.random.PRNGKey(0)

    # ---- Test 1: toy shape implied by the forward, steady-state (prepared) path.
    B, S, c_in, d_model = 2, 8, 4, 32
    kx, kw, kb = jax.random.split(key, 3)
    bound = 1.0 / math.sqrt(c_in)
    weight = jax.random.uniform(kw, (d_model, c_in), jnp.float32, -bound, bound)
    bias = jax.random.uniform(kb, (d_model,), jnp.float32, -bound, bound)
    x = jax.random.normal(kx, (B, S, c_in), jnp.float32)

    w_t, b2d = prepare_linear_params(weight, bias)        # hoisted out of forward
    fwd = jax.jit(token_embedding_fwd)
    y = jax.block_until_ready(fwd(x, w_t, b2d))
    y_ref = x @ weight.T + bias
    assert y.shape == (B, S, d_model)
    assert jnp.allclose(y, y_ref, atol=1e-5, rtol=1e-5)

    # ---- Test 2: ragged M tail + non-128 d_model, no padding/slicing copies.
    # M=1200 rows, TM=256 -> 5 row tiles (last masked); N=96 -> full-extent N block.
    B2, S2, c2, d2 = 4, 300, 7, 96
    k2x, k2w, k2b = jax.random.split(jax.random.PRNGKey(1), 3)
    bound2 = 1.0 / math.sqrt(c2)
    w2 = jax.random.uniform(k2w, (d2, c2), jnp.float32, -bound2, bound2)
    b2 = jax.random.uniform(k2b, (d2,), jnp.float32, -bound2, bound2)
    x2 = jax.random.normal(k2x, (B2, S2, c2), jnp.float32)
    y2 = jax.block_until_ready(token_embedding_basic(x2, w2, b2, block_m=256))
    y2_ref = x2 @ w2.T + b2
    assert y2.shape == (B2, S2, d2)
    assert jnp.allclose(y2, y2_ref, atol=1e-4, rtol=1e-4)

    # ---- Test 3: exercise the N grid axis (lane-dense TN, x resident across j).
    B3, S3, c3, d3 = 2, 64, 16, 256
    k3x, k3w, k3b = jax.random.split(jax.random.PRNGKey(2), 3)
    bound3 = 1.0 / math.sqrt(c3)
    w3 = jax.random.uniform(k3w, (d3, c3), jnp.float32, -bound3, bound3)
    b3 = jax.random.uniform(k3b, (d3,), jnp.float32, -bound3, bound3)
    x3 = jax.random.normal(k3x, (B3, S3, c3), jnp.float32)
    y3 = jax.block_until_ready(token_embedding_basic(x3, w3, b3, block_m=64, block_n=128))
    y3_ref = x3 @ w3.T + b3
    assert y3.shape == (B3, S3, d3)
    assert jnp.allclose(y3, y3_ref, atol=1e-4, rtol=1e-4)

    # ---- Test 4: bf16 output path (halves output HBM writeback).
    y4 = jax.block_until_ready(
        token_embedding_fwd(x, w_t, b2d, out_dtype=jnp.bfloat16))
    assert y4.dtype == jnp.bfloat16
    assert jnp.allclose(y4.astype(jnp.float32), y_ref, atol=5e-2, rtol=5e-2)

    print("KERNEL_OK")
</pallas_src>

<mosaic_0001>
module attributes {stable_mosaic.version = 11 : i64} {
  func.func @_linear_kernel(%arg0: i32, %arg1: i32, %arg2: memref<16x4xf32, #tpu.memory_space<vmem>>, %arg3: memref<4x32xf32, #tpu.memory_space<vmem>>, %arg4: memref<1x32xf32, #tpu.memory_space<vmem>>, %arg5: memref<16x32xf32, #tpu.memory_space<vmem>>) attributes {dimension_semantics = [#tpu.dimension_semantics<parallel>, #tpu.dimension_semantics<parallel>], iteration_bounds = array<i64: 1, 1>, scalar_prefetch = 0 : i64, scratch_operands = 0 : i64, tpu.core_type = #tpu.core_type<tc>, window_params = [{transform_indices = @transform_0, window_bounds = array<i64: 16, 4>}, {transform_indices = @transform_1, window_bounds = array<i64: 4, 32>}, {transform_indices = @transform_2, window_bounds = array<i64: 1, 32>}, {transform_indices = @transform_3, window_bounds = array<i64: 16, 32>}]} {
    %c0 = arith.constant 0 : index
    %c0_0 = arith.constant 0 : index
    %0 = vector.load %arg2[%c0, %c0_0] : memref<16x4xf32, #tpu.memory_space<vmem>>, vector<16x4xf32>
    %c0_1 = arith.constant 0 : index
    %c0_2 = arith.constant 0 : index
    %1 = vector.load %arg3[%c0_1, %c0_2] : memref<4x32xf32, #tpu.memory_space<vmem>>, vector<4x32xf32>
    %cst = arith.constant dense<0.000000e+00> : vector<16x32xf32>
    %2 = tpu.matmul %0, %1, %cst {dimension_numbers = #tpu.dot_dimension_numbers<[1], [0], [0], [1], [0, 0, 1, 1], [], []>} : vector<16x4xf32>, vector<4x32xf32>, vector<16x32xf32> -> vector<16x32xf32>
    %c0_3 = arith.constant 0 : index
    %c0_4 = arith.constant 0 : index
    %3 = vector.load %arg4[%c0_3, %c0_4] : memref<1x32xf32, #tpu.memory_space<vmem>>, vector<1x32xf32>
    %4 = vector.broadcast %3 : vector<1x32xf32> to vector<16x32xf32>
    %5 = arith.addf %2, %4 : vector<16x32xf32>
    %c0_5 = arith.constant 0 : index
    %c0_6 = arith.constant 0 : index
    %6 = vector.load %arg5[%c0_5, %c0_6] : memref<16x32xf32, #tpu.memory_space<vmem>>, vector<16x32xf32>
    tpu.vector_store %arg5[%c0_5, %c0_6], %5 {strides = array<i32>} : memref<16x32xf32, #tpu.memory_space<vmem>>, vector<16x32xf32>,
    return
  }
  func.func @transform_0(%arg0: i32, %arg1: i32) -> (i32, i32) {
    %c0_i32 = arith.constant 0 : i32
    %c0_i32_0 = arith.constant 0 : i32
    return %arg0, %c0_i32 : i32, i32
  }
  func.func @transform_1(%arg0: i32, %arg1: i32) -> (i32, i32) {
    %c0_i32 = arith.constant 0 : i32
    %c0_i32_0 = arith.constant 0 : i32
    return %c0_i32, %arg1 : i32, i32
  }
  func.func @transform_2(%arg0: i32, %arg1: i32) -> (i32, i32) {
    %c0_i32 = arith.constant 0 : i32
    %c0_i32_0 = arith.constant 0 : i32
    return %c0_i32, %arg1 : i32, i32
  }
  func.func @transform_3(%arg0: i32, %arg1: i32) -> (i32, i32) {
    %c0_i32 = arith.constant 0 : i32
    return %arg0, %arg1 : i32, i32
  }
}

</mosaic_0001>

<bundles_post_ra>
// kernel: token_embedding_fwd.1
= control target key start
LH: loop header
LB: loop body
LE: loop exit
PB: predicated region body
PF: predicated region fallthrough
CT: control target
= control target key end

     0   :  { %vm32_vm0 = vcmask 1043456   ;;  %vm25_vm1 = vcmask 31744   ;;  %s205_s0 = inlined_call_operand.vmem [shape: f32[16,4], index: 0, kind: input, shape index: {}]   ;;  %s206_s1 = inlined_call_operand.vmem [shape: f32[4,32], index: 1, kind: input, shape index: {}]   ;;  %s207_s2 = inlined_call_operand.vmem [shape: f32[1,32], index: 2, kind: input, shape index: {}]   ;;  %s208_s3 = inlined_call_operand.hbm [shape: f32[16,32], index: 3, kind: output, shape index: {}]  }
   0x1   :  { %v17_v0 = vld [vmem:[%s206_s1] sm:$0xf]  ;;  %v16_v2 = vld [vmem:[%s205_s0 + $0x8] sm:$0xff] }
   0x2   :  { %v15_v1 = vld [vmem:[%s205_s0] sm:$0xff]  ;;  %137 = vmatprep.subr.msk.mxu0 %vm32_vm0, %v17_v0 }
   0x3   :  { %139 = vmatprep.mubr.msk.f32.mxu0 %vm25_vm1, %v15_v1 }
   0x4   :  { %8 = vsyncpa [#allocation3], 0  ;;  %138 = vmatpush3.msk.msra.mxu0 %vm32_vm0, %v17_v0  ;;  %v130_v3 = vld [vmem:[%s207_s2] ss:$0 sm:$0xff]  ;;  %s167_s1 = smov [#allocation2]   ;;  %vm111_vm2 = vcmask 261120  }
   0x5   :  { %140 = vmatmul.mubr.msk.f32.vlgmr.msra.gmra.mxu0 %vm25_vm1, %v16_v2  ;;  %s119_s20 = sshll.u32 %s167_s1, 4  ;;  %s120_s20 = int_to_ptr.vmem [resolvable:$true] %s119_s20 }
   0x6   :  { %s145_s0 = scalar_lea.vmem %s120_s20, 256  ;;  %p150_p1 = scmp.lt.s32.totalorder %s120_s20, %s120_s20 }
   0x7   :  { %p146_p0 = scmp.ne.s32.totalorder %s120_s20, %s145_s0  ;;  %p151_p2 = scmp.lt.s32.totalorder %s145_s0, %s145_s0 }
   0x9   :  { %p152_p3 = por %p151_p2, %p150_p1 }
   0xb   :  { %p153_p4 = pnand %p152_p3, %p146_p0 }
  0xc5   :  { %v141_v4 = vpop.f32.mrf.mxu0 }
  0xc6   :  { %v108_v5 = vadd.f32 %v141_v4, %v130_v3 }
  0xc7   :  { %v102_v6 = vpop.f32.mrf.mxu0 }
  0xc8   :  { %113 = vst.msk [vmem:[#allocation2 + $0x8] sm:$0xff] %vm111_vm2, %v108_v5  ;;  %v103_v7 = vadd.f32 %v130_v3, %v102_v6 }
  0xca   :  { %112 = vst.msk [vmem:[#allocation2] sm:$0xff] %vm111_vm2, %v103_v7 }
  0xcb   :  { %156 = shalt.err (!%p153_p4)
}
  0xcc   :  { %s168_s21 = smov 128   ;;  %s169_s22 = smov 8  }
  0xcd   :  { %125 = dma.vmem_to_hbm [thread:$0]  %s120_s20, 256, %s208_s3, [#allocation3], %s168_s21, %s168_s21, %s169_s22  }
  0xce   :  { %165 = dma.done.wait [#allocation3], 256  }
  0xcf   :  { %166 = vsyncadd [#allocation3], 4294967040 }
  0xd0   :  { %129 = vsyncpa [#allocation3], 1 }

</bundles_post_ra>
